<compile_context>
chip_gen: v7x
topology: tpu7x:2x2x1
jax: 0.10.0
libtpu: 0.0.40
codegen_flags: <defaults>
</compile_context>

<pallas_src>
import functools

import numpy as np

import jax
import jax.numpy as jnp
from jax.experimental import pallas as pl
from jax.experimental.pallas import tpu as pltpu


def _conv_relu_kernel(x_ref, w_ref, b_ref, o_ref, xpad_ref, *,
                      K, stride, dilation, pad, pad_top, H, H_out, n_blk):
    # x_ref   : (n_blk*H, W*C_in)           n_blk batch images, rows stacked
    # w_ref   : (K, W*C_in, W_out*C_out)    banded per-kh weight slabs (resident)
    # b_ref   : (1, W_out*C_out)            bias tiled over W_out (resident)
    # o_ref   : (n_blk*H_out, W_out*C_out)  lane-dense output (128-wide stores)
    # xpad_ref: (n_blk, pad_top + H + pad, W*C_in)  VMEM scratch, H-padded copy
    WC = x_ref.shape[-1]
    WOC = o_ref.shape[-1]

    # Zero only the pad rows the kh slabs actually read (not the whole scratch).
    # NOTE: the scratch persists across grid steps; these rows are re-zeroed
    # every step, so nothing else may reuse them for other data.
    if pad > 0:
        zrows = jnp.zeros((pad, WC), dtype=xpad_ref.dtype)
        for i in range(n_blk):
            xpad_ref[i, pad_top - pad:pad_top, :] = zrows
            xpad_ref[i, pad_top + H:pad_top + H + pad, :] = zrows

    # Copy x at a sublane-aligned offset (pad_top % 8 == 0) -> unmasked stores.
    for i in range(n_blk):
        xpad_ref[i, pad_top:pad_top + H, :] = x_ref[i * H:(i + 1) * H, :]

    acc = jnp.zeros((n_blk * H_out, WOC), dtype=jnp.float32)
    for kh in range(K):                      # K (not K*K) MXU contractions
        h0 = pad_top - pad + kh * dilation
        parts = []
        for i in range(n_blk):
            if stride == 1:
                parts.append(xpad_ref[i, h0:h0 + H_out, :])
            else:
                # TODO(synk): fold the stride into the xpad copy (contiguous
                # slab reads) instead of a strided sublane read per kh.
                parts.append(xpad_ref[i, pl.ds(h0, H_out, stride), :])
        slab = parts[0] if n_blk == 1 else jnp.concatenate(parts, axis=0)
        acc = acc + jnp.dot(slab, w_ref[kh],
                            preferred_element_type=jnp.float32,
                            precision=jax.lax.Precision.HIGHEST)

    acc = acc + b_ref[...].astype(jnp.float32)        # bias broadcast over rows
    o_ref[...] = jnp.maximum(acc, 0.0).astype(o_ref.dtype)   # ReLU


def _build_banded_weights(weight, *, W, W_out, stride, dilation, pad):
    """(C_out, C_in, K, K) -> (K, W*C_in, W_out*C_out) banded matmul weights.

    Wbig[kh, wi*C_in + ci, wo*C_out + co] = weight[co, ci, kh, kw]
        when wi == wo*stride + kw*dilation - pad and 0 <= wi < W, else 0.
    Folds the W-direction taps, stride, dilation and W zero-padding into the
    weight matrix so the kernel only loops over kh.
    """
    C_out, C_in, K, _ = weight.shape
    S = np.zeros((K, W, W_out), dtype=np.float32)      # static placement mask
    for kw in range(K):
        for wo in range(W_out):
            wi = wo * stride + kw * dilation - pad
            if 0 <= wi < W:
                S[kw, wi, wo] = 1.0
    # (kw, wi, wo) x (co, ci, kh, kw) -> (kh, wi, ci, wo, co)
    w_big = jnp.einsum('xvw,ocyx->yvcwo',
                       jnp.asarray(S, dtype=weight.dtype), weight)
    return w_big.reshape(K, W * C_in, W_out * C_out)


class ConvBlockPallas:
    """Conv2d(padding=dilation*(k-1)//2) + ReLU with weights prepared once.

    Matches the forward pass of the PyTorch `_conv_block_` module (NCHW in,
    NCHW out).  The banded weight / tiled bias are built once per input
    spatial shape and cached, not rebuilt every call.

    batch_block: images folded into one grid step.  Default None -> the whole
    batch (grid length 1; right for the single TensorCore of v5e/v6e).  On
    v7x set batch_block = N // 2 so each of the two TensorCores takes half
    the batch (the weights are resident/cached, so the split is compute-side).
    """

    def __init__(self, weight, bias, *, kernel_size, stride, dilation,
                 batch_block=None):
        self.weight = jnp.asarray(weight)                 # (C_out, C_in, K, K)
        C_out = self.weight.shape[0]
        self.bias = (jnp.zeros((C_out,), self.weight.dtype) if bias is None
                     else jnp.asarray(bias))
        self.kernel_size = int(kernel_size)
        self.stride = int(stride)
        self.dilation = int(dilation)
        self.pad = self.dilation * (self.kernel_size - 1) // 2
        self.batch_block = batch_block
        self._prepared = {}   # (H, W) -> (w_big, b_fused, H_out, W_out)

    def _prepare(self, H, W):
        key = (H, W)
        if key not in self._prepared:
            K, s, d, pad = self.kernel_size, self.stride, self.dilation, self.pad
            C_out = self.weight.shape[0]
            H_out = (H + 2 * pad - d * (K - 1) - 1) // s + 1
            W_out = (W + 2 * pad - d * (K - 1) - 1) // s + 1
            w_big = _build_banded_weights(self.weight, W=W, W_out=W_out,
                                          stride=s, dilation=d, pad=pad)
            b_fused = jnp.tile(self.bias, W_out).reshape(1, W_out * C_out)
            self._prepared[key] = (w_big, b_fused, H_out, W_out)
        return self._prepared[key]

    def apply_nhwc(self, x_nhwc):
        """Channels-last entry point: (N, H, W, C_in) -> (N, H_out, W_out, C_out)."""
        N, H, W, C_in = x_nhwc.shape
        K, s, d, pad = self.kernel_size, self.stride, self.dilation, self.pad
        C_out = self.weight.shape[0]
        w_big, b_fused, H_out, W_out = self._prepare(H, W)
        WC, WOC = W * C_in, W_out * C_out

        n_blk = N if self.batch_block is None else int(self.batch_block)
        if N % n_blk != 0:
            raise ValueError(f"batch {N} not divisible by batch_block {n_blk}")
        grid = (N // n_blk,)

        # Sublane-aligned offset for the x copy inside the scratch.
        pad_top = 0 if pad == 0 else ((pad + 7) // 8) * 8
        Hp = pad_top + H + pad

        x_rows = x_nhwc.reshape(N * H, WC)     # lane-fuse W,C; fold batch into rows

        kernel = functools.partial(
            _conv_relu_kernel,
            K=K, stride=s, dilation=d, pad=pad, pad_top=pad_top,
            H=H, H_out=H_out, n_blk=n_blk)

        out_rows = pl.pallas_call(
            kernel,
            out_shape=jax.ShapeDtypeStruct((N * H_out, WOC), x_nhwc.dtype),
            grid_spec=pltpu.PrefetchScalarGridSpec(
                num_scalar_prefetch=0,
                grid=grid,
                in_specs=[
                    pl.BlockSpec((n_blk * H, WC), lambda g: (g, 0)),
                    pl.BlockSpec((K, WC, WOC), lambda g: (0, 0, 0)),   # resident
                    pl.BlockSpec((1, WOC), lambda g: (0, 0)),          # resident
                ],
                out_specs=pl.BlockSpec((n_blk * H_out, WOC), lambda g: (g, 0)),
                scratch_shapes=[pltpu.VMEM((n_blk, Hp, WC), x_nhwc.dtype)],
            ),
            compiler_params=pltpu.CompilerParams(
                dimension_semantics=("parallel",)),
        )(x_rows, w_big, b_fused)

        return out_rows.reshape(N, H_out, W_out, C_out)

    def __call__(self, x_nchw):
        """PyTorch-compatible forward: NCHW in, NCHW out."""
        # TODO(synk): channels-last callers should use apply_nhwc directly and
        # skip these two transposes.
        x_nhwc = jnp.transpose(x_nchw, (0, 2, 3, 1))
        out_nhwc = self.apply_nhwc(x_nhwc)
        return jnp.transpose(out_nhwc, (0, 3, 1, 2))


def _reference(x_nchw, weight, bias, *, kernel_size, stride, dilation):
    pad = dilation * (kernel_size - 1) // 2
    y = jax.lax.conv_general_dilated(
        x_nchw, weight,
        window_strides=(stride, stride),
        padding=((pad, pad), (pad, pad)),
        rhs_dilation=(dilation, dilation),
        dimension_numbers=("NCHW", "OIHW", "NCHW"),
        precision=jax.lax.Precision.HIGHEST,
    )
    y = y + bias.reshape(1, -1, 1, 1)
    return jnp.maximum(y, 0.0)


def _run_case(key, *, N, C_in, C_out, H, W, K, stride, dilation, zero_bias):
    kx, kw, kb = jax.random.split(key, 3)
    x = jax.random.normal(kx, (N, C_in, H, W), dtype=jnp.float32)

    # Deterministic xavier_uniform_ init (matches _conv_block_.initialize_weights()).
    fan_in = C_in * K * K
    fan_out = C_out * K * K
    bound = (6.0 / (fan_in + fan_out)) ** 0.5
    weight = jax.random.uniform(kw, (C_out, C_in, K, K),
                                minval=-bound, maxval=bound, dtype=jnp.float32)
    bias = (jnp.zeros((C_out,), jnp.float32) if zero_bias
            else 0.1 * jax.random.normal(kb, (C_out,), dtype=jnp.float32))

    block = ConvBlockPallas(weight, bias, kernel_size=K,
                            stride=stride, dilation=dilation)
    out = jax.block_until_ready(block(x))
    ref = _reference(x, weight, bias,
                     kernel_size=K, stride=stride, dilation=dilation)
    assert out.shape == ref.shape, (out.shape, ref.shape)
    assert jnp.allclose(out, ref, atol=1e-5, rtol=1e-5), "mismatch vs reference"

    # Second call reuses the cached banded weight / bias (no rebuild).
    out2 = jax.block_until_ready(block(x))
    assert jnp.allclose(out2, ref, atol=1e-5, rtol=1e-5), "cached-call mismatch"


if __name__ == "__main__":
    key = jax.random.PRNGKey(0)
    k1, k2 = jax.random.split(key)

    # Shapes consistent with the module: batch=2, in_ch=4, out_ch=8, spatial=16.
    _run_case(k1, N=2, C_in=4, C_out=8, H=16, W=16,
              K=3, stride=1, dilation=1, zero_bias=True)
    # Dilated variant with a non-zero bias (exercises pad=2 and the bias add).
    _run_case(k2, N=2, C_in=4, C_out=8, H=16, W=16,
              K=3, stride=1, dilation=2, zero_bias=False)

    print("KERNEL_OK")
</pallas_src>

<mosaic_0001>
module attributes {stable_mosaic.version = 11 : i64} {
  func.func @_conv_relu_kernel(%arg0: i32, %arg1: memref<32x64xf32, #tpu.memory_space<vmem>>, %arg2: memref<3x64x128xf32, #tpu.memory_space<vmem>>, %arg3: memref<1x128xf32, #tpu.memory_space<vmem>>, %arg4: memref<32x128xf32, #tpu.memory_space<vmem>>, %arg5: memref<2x25x64xf32, #tpu.memory_space<vmem>>) attributes {dimension_semantics = [#tpu.dimension_semantics<parallel>], iteration_bounds = array<i64: 1>, scalar_prefetch = 0 : i64, scratch_operands = 1 : i64, tpu.core_type = #tpu.core_type<tc>, window_params = [{transform_indices = @transform_0, window_bounds = array<i64: 32, 64>}, {pipeline_mode = #tpu.pipeline_mode<synchronous>, transform_indices = @transform_1, window_bounds = array<i64: 3, 64, 128>}, {pipeline_mode = #tpu.pipeline_mode<synchronous>, transform_indices = @transform_2, window_bounds = array<i64: 1, 128>}, {transform_indices = @transform_3, window_bounds = array<i64: 32, 128>}]} {
    %cst = arith.constant 0.000000e+00 : f32
    %0 = vector.broadcast %cst : f32 to vector<1x64xf32>
    %c0 = arith.constant 0 : index
    %c7 = arith.constant 7 : index
    %c0_0 = arith.constant 0 : index
    %1 = vector.load %arg5[%c0, %c7, %c0_0] : memref<2x25x64xf32, #tpu.memory_space<vmem>>, vector<1x1x64xf32>
    %2 = vector.shape_cast %1 : vector<1x1x64xf32> to vector<1x64xf32>
    %3 = vector.shape_cast %0 : vector<1x64xf32> to vector<1x1x64xf32>
    tpu.vector_store %arg5[%c0, %c7, %c0_0], %3 {strides = array<i32>} : memref<2x25x64xf32, #tpu.memory_space<vmem>>, vector<1x1x64xf32>,
    %c0_1 = arith.constant 0 : index
    %c24 = arith.constant 24 : index
    %c0_2 = arith.constant 0 : index
    %4 = vector.load %arg5[%c0_1, %c24, %c0_2] : memref<2x25x64xf32, #tpu.memory_space<vmem>>, vector<1x1x64xf32>
    %5 = vector.shape_cast %4 : vector<1x1x64xf32> to vector<1x64xf32>
    %6 = vector.shape_cast %0 : vector<1x64xf32> to vector<1x1x64xf32>
    tpu.vector_store %arg5[%c0_1, %c24, %c0_2], %6 {strides = array<i32>} : memref<2x25x64xf32, #tpu.memory_space<vmem>>, vector<1x1x64xf32>,
    %c1 = arith.constant 1 : index
    %c7_3 = arith.constant 7 : index
    %c0_4 = arith.constant 0 : index
    %7 = vector.load %arg5[%c1, %c7_3, %c0_4] : memref<2x25x64xf32, #tpu.memory_space<vmem>>, vector<1x1x64xf32>
    %8 = vector.shape_cast %7 : vector<1x1x64xf32> to vector<1x64xf32>
    %9 = vector.shape_cast %0 : vector<1x64xf32> to vector<1x1x64xf32>
    tpu.vector_store %arg5[%c1, %c7_3, %c0_4], %9 {strides = array<i32>} : memref<2x25x64xf32, #tpu.memory_space<vmem>>, vector<1x1x64xf32>,
    %c1_5 = arith.constant 1 : index
    %c24_6 = arith.constant 24 : index
    %c0_7 = arith.constant 0 : index
    %10 = vector.load %arg5[%c1_5, %c24_6, %c0_7] : memref<2x25x64xf32, #tpu.memory_space<vmem>>, vector<1x1x64xf32>
    %11 = vector.shape_cast %10 : vector<1x1x64xf32> to vector<1x64xf32>
    %12 = vector.shape_cast %0 : vector<1x64xf32> to vector<1x1x64xf32>
    tpu.vector_store %arg5[%c1_5, %c24_6, %c0_7], %12 {strides = array<i32>} : memref<2x25x64xf32, #tpu.memory_space<vmem>>, vector<1x1x64xf32>,
    %c0_8 = arith.constant 0 : index
    %c0_9 = arith.constant 0 : index
    %13 = vector.load %arg1[%c0_8, %c0_9] : memref<32x64xf32, #tpu.memory_space<vmem>>, vector<16x64xf32>
    %c0_10 = arith.constant 0 : index
    %c8 = arith.constant 8 : index
    %c0_11 = arith.constant 0 : index
    %14 = vector.load %arg5[%c0_10, %c8, %c0_11] : memref<2x25x64xf32, #tpu.memory_space<vmem>>, vector<1x16x64xf32>
    %15 = vector.shape_cast %14 : vector<1x16x64xf32> to vector<16x64xf32>
    %16 = vector.shape_cast %13 : vector<16x64xf32> to vector<1x16x64xf32>
    tpu.vector_store %arg5[%c0_10, %c8, %c0_11], %16 {strides = array<i32>} : memref<2x25x64xf32, #tpu.memory_space<vmem>>, vector<1x16x64xf32>,
    %c16 = arith.constant 16 : index
    %c0_12 = arith.constant 0 : index
    %17 = vector.load %arg1[%c16, %c0_12] : memref<32x64xf32, #tpu.memory_space<vmem>>, vector<16x64xf32>
    %c1_13 = arith.constant 1 : index
    %c8_14 = arith.constant 8 : index
    %c0_15 = arith.constant 0 : index
    %18 = vector.load %arg5[%c1_13, %c8_14, %c0_15] : memref<2x25x64xf32, #tpu.memory_space<vmem>>, vector<1x16x64xf32>
    %19 = vector.shape_cast %18 : vector<1x16x64xf32> to vector<16x64xf32>
    %20 = vector.shape_cast %17 : vector<16x64xf32> to vector<1x16x64xf32>
    tpu.vector_store %arg5[%c1_13, %c8_14, %c0_15], %20 {strides = array<i32>} : memref<2x25x64xf32, #tpu.memory_space<vmem>>, vector<1x16x64xf32>,
    %cst_16 = arith.constant 0.000000e+00 : f32
    %21 = vector.broadcast %cst_16 : f32 to vector<32x128xf32>
    %c0_17 = arith.constant 0 : index
    %c7_18 = arith.constant 7 : index
    %c0_19 = arith.constant 0 : index
    %22 = vector.load %arg5[%c0_17, %c7_18, %c0_19] : memref<2x25x64xf32, #tpu.memory_space<vmem>>, vector<1x16x64xf32>
    %23 = vector.shape_cast %22 : vector<1x16x64xf32> to vector<16x64xf32>
    %c1_20 = arith.constant 1 : index
    %c7_21 = arith.constant 7 : index
    %c0_22 = arith.constant 0 : index
    %24 = vector.load %arg5[%c1_20, %c7_21, %c0_22] : memref<2x25x64xf32, #tpu.memory_space<vmem>>, vector<1x16x64xf32>
    %25 = vector.shape_cast %24 : vector<1x16x64xf32> to vector<16x64xf32>
    %26 = tpu.concatenate %23, %25 in 0 : vector<16x64xf32>, vector<16x64xf32> -> vector<32x64xf32>
    %c0_23 = arith.constant 0 : index
    %c0_24 = arith.constant 0 : index
    %c0_25 = arith.constant 0 : index
    %27 = vector.load %arg2[%c0_23, %c0_24, %c0_25] : memref<3x64x128xf32, #tpu.memory_space<vmem>>, vector<1x64x128xf32>
    %28 = vector.shape_cast %27 : vector<1x64x128xf32> to vector<64x128xf32>
    %cst_26 = arith.constant dense<0.000000e+00> : vector<32x128xf32>
    %29 = tpu.matmul %26, %28, %cst_26 {dimension_numbers = #tpu.dot_dimension_numbers<[1], [0], [0], [1], [0, 0, 1, 1], [], []>, precision = #tpu.contract_precision<fp32>} : vector<32x64xf32>, vector<64x128xf32>, vector<32x128xf32> -> vector<32x128xf32>
    %30 = arith.addf %21, %29 : vector<32x128xf32>
    %c0_27 = arith.constant 0 : index
    %c8_28 = arith.constant 8 : index
    %c0_29 = arith.constant 0 : index
    %31 = vector.load %arg5[%c0_27, %c8_28, %c0_29] : memref<2x25x64xf32, #tpu.memory_space<vmem>>, vector<1x16x64xf32>
    %32 = vector.shape_cast %31 : vector<1x16x64xf32> to vector<16x64xf32>
    %c1_30 = arith.constant 1 : index
    %c8_31 = arith.constant 8 : index
    %c0_32 = arith.constant 0 : index
    %33 = vector.load %arg5[%c1_30, %c8_31, %c0_32] : memref<2x25x64xf32, #tpu.memory_space<vmem>>, vector<1x16x64xf32>
    %34 = vector.shape_cast %33 : vector<1x16x64xf32> to vector<16x64xf32>
    %35 = tpu.concatenate %32, %34 in 0 : vector<16x64xf32>, vector<16x64xf32> -> vector<32x64xf32>
    %c1_33 = arith.constant 1 : index
    %c0_34 = arith.constant 0 : index
    %c0_35 = arith.constant 0 : index
    %36 = vector.load %arg2[%c1_33, %c0_34, %c0_35] : memref<3x64x128xf32, #tpu.memory_space<vmem>>, vector<1x64x128xf32>
    %37 = vector.shape_cast %36 : vector<1x64x128xf32> to vector<64x128xf32>
    %cst_36 = arith.constant dense<0.000000e+00> : vector<32x128xf32>
    %38 = tpu.matmul %35, %37, %cst_36 {dimension_numbers = #tpu.dot_dimension_numbers<[1], [0], [0], [1], [0, 0, 1, 1], [], []>, precision = #tpu.contract_precision<fp32>} : vector<32x64xf32>, vector<64x128xf32>, vector<32x128xf32> -> vector<32x128xf32>
    %39 = arith.addf %30, %38 : vector<32x128xf32>
    %c0_37 = arith.constant 0 : index
    %c9 = arith.constant 9 : index
    %c0_38 = arith.constant 0 : index
    %40 = vector.load %arg5[%c0_37, %c9, %c0_38] : memref<2x25x64xf32, #tpu.memory_space<vmem>>, vector<1x16x64xf32>
    %41 = vector.shape_cast %40 : vector<1x16x64xf32> to vector<16x64xf32>
    %c1_39 = arith.constant 1 : index
    %c9_40 = arith.constant 9 : index
    %c0_41 = arith.constant 0 : index
    %42 = vector.load %arg5[%c1_39, %c9_40, %c0_41] : memref<2x25x64xf32, #tpu.memory_space<vmem>>, vector<1x16x64xf32>
    %43 = vector.shape_cast %42 : vector<1x16x64xf32> to vector<16x64xf32>
    %44 = tpu.concatenate %41, %43 in 0 : vector<16x64xf32>, vector<16x64xf32> -> vector<32x64xf32>
    %c2 = arith.constant 2 : index
    %c0_42 = arith.constant 0 : index
    %c0_43 = arith.constant 0 : index
    %45 = vector.load %arg2[%c2, %c0_42, %c0_43] : memref<3x64x128xf32, #tpu.memory_space<vmem>>, vector<1x64x128xf32>
    %46 = vector.shape_cast %45 : vector<1x64x128xf32> to vector<64x128xf32>
    %cst_44 = arith.constant dense<0.000000e+00> : vector<32x128xf32>
    %47 = tpu.matmul %44, %46, %cst_44 {dimension_numbers = #tpu.dot_dimension_numbers<[1], [0], [0], [1], [0, 0, 1, 1], [], []>, precision = #tpu.contract_precision<fp32>} : vector<32x64xf32>, vector<64x128xf32>, vector<32x128xf32> -> vector<32x128xf32>
    %48 = arith.addf %39, %47 : vector<32x128xf32>
    %c0_45 = arith.constant 0 : index
    %c0_46 = arith.constant 0 : index
    %49 = vector.load %arg3[%c0_45, %c0_46] : memref<1x128xf32, #tpu.memory_space<vmem>>, vector<1x128xf32>
    %50 = vector.broadcast %49 : vector<1x128xf32> to vector<32x128xf32>
    %51 = arith.addf %48, %50 : vector<32x128xf32>
    %cst_47 = arith.constant 0.000000e+00 : f32
    %52 = vector.broadcast %cst_47 : f32 to vector<32x128xf32>
    %53 = arith.maximumf %51, %52 : vector<32x128xf32>
    %c0_48 = arith.constant 0 : index
    %c0_49 = arith.constant 0 : index
    %54 = vector.load %arg4[%c0_48, %c0_49] : memref<32x128xf32, #tpu.memory_space<vmem>>, vector<32x128xf32>
    tpu.vector_store %arg4[%c0_48, %c0_49], %53 {strides = array<i32>} : memref<32x128xf32, #tpu.memory_space<vmem>>, vector<32x128xf32>,
    return
  }
  func.func @transform_0(%arg0: i32) -> (i32, i32) {
    %c0_i32 = arith.constant 0 : i32
    %c0_i32_0 = arith.constant 0 : i32
    return %arg0, %c0_i32 : i32, i32
  }
  func.func @transform_1(%arg0: i32) -> (i32, i32, i32) {
    %c0_i32 = arith.constant 0 : i32
    %c0_i32_0 = arith.constant 0 : i32
    %c0_i32_1 = arith.constant 0 : i32
    %c0_i32_2 = arith.constant 0 : i32
    return %c0_i32, %c0_i32_0, %c0_i32_1 : i32, i32, i32
  }
  func.func @transform_2(%arg0: i32) -> (i32, i32) {
    %c0_i32 = arith.constant 0 : i32
    %c0_i32_0 = arith.constant 0 : i32
    %c0_i32_1 = arith.constant 0 : i32
    return %c0_i32, %c0_i32_0 : i32, i32
  }
  func.func @transform_3(%arg0: i32) -> (i32, i32) {
    %c0_i32 = arith.constant 0 : i32
    %c0_i32_0 = arith.constant 0 : i32
    return %arg0, %c0_i32 : i32, i32
  }
}

</mosaic_0001>

<bundles_post_ra>
// kernel: tpu_custom_call.1
= control target key start
LH: loop header
LB: loop body
LE: loop exit
PB: predicated region body
PF: predicated region fallthrough
CT: control target
= control target key end

     0   :  { %8 = vsyncpa [#allocation4], 0  ;;  %s3914_s0 = inlined_call_operand.hbm [shape: f32[32,64], index: 0, kind: input, shape index: {}]   ;;  %s3915_s1 = inlined_call_operand.hbm [shape: f32[3,64,128], index: 1, kind: input, shape index: {}]   ;;  %s3916_s2 = inlined_call_operand.vmem [shape: f32[1,128], index: 2, kind: input, shape index: {}]   ;;  %s3917_s3 = inlined_call_operand.hbm [shape: f32[32,128], index: 3, kind: output, shape index: {}]  }
   0x1   :  { %9 = vsyncpa [#allocation7], 0 }
   0x2   :  { %10 = vsyncpa [#allocation5], 0  ;;  %s3218_s12 = smov [#allocation3]   ;;  %s3146_s16 = scalar_lea.hbm %s3914_s0, 512 }
   0x3   :  { %s16_s13 = sshll.u32 %s3218_s12, 4  ;;  %p3147_p0 = scmp.ne.s32.totalorder %s3914_s0, %s3146_s16  ;;  %s17_s13 = int_to_ptr.vmem [resolvable:$true] %s16_s13 }
   0x4   :  { %p3150_p1 = scmp.lt.u32.totalorder %s3146_s16, %s3914_s0 }
   0x6   :  { %p3152_p2 = pnand %p3150_p1, %p3147_p0 }
   0x8   :  { %3155 = shalt.err (!%p3152_p2)
}
   0x9   :  { %s3156_s21 = scalar_lea.vmem %s17_s13, 512  ;;  %p3161_p4 = scmp.lt.s32.totalorder %s17_s13, %s17_s13 }
   0xa   :  { %p3157_p3 = scmp.ne.s32.totalorder %s17_s13, %s3156_s21  ;;  %p3162_p5 = scmp.lt.s32.totalorder %s3156_s21, %s3156_s21 }
   0xc   :  { %p3163_p6 = por %p3162_p5, %p3161_p4 }
   0xe   :  { %p3164_p7 = pnand %p3163_p6, %p3157_p3 }
  0x10   :  { %3167 = shalt.err (!%p3164_p7)
}
  0x11   :  { %s3219_s22 = smov 128   ;;  %s3220_s23 = smov 8  }
  0x12   :  { %22 = dma.hbm_to_vmem [thread:$0]  %s3914_s0, 512, %s17_s13, [#allocation4], %s3219_s22, %s3219_s22, %s3220_s23  }
  0x13   :  { %s3221_s26 = smov [#allocation6]   ;;  %s3168_s30 = scalar_lea.hbm %s3915_s1, 3072 }
  0x14   :  { %s28_s27 = sshll.u32 %s3221_s26, 4  ;;  %p3169_p8 = scmp.ne.s32.totalorder %s3915_s1, %s3168_s30  ;;  %s29_s27 = int_to_ptr.vmem [resolvable:$true] %s28_s27 }
  0x15   :  { %p3172_p9 = scmp.lt.u32.totalorder %s3168_s30, %s3915_s1 }
  0x17   :  { %p3174_p10 = pnand %p3172_p9, %p3169_p8 }
  0x19   :  { %3177 = shalt.err (!%p3174_p10)
}
  0x1a   :  { %s3178_s8 = scalar_lea.vmem %s29_s27, 3072  ;;  %p3183_p12 = scmp.lt.s32.totalorder %s29_s27, %s29_s27 }
  0x1b   :  { %p3179_p11 = scmp.ne.s32.totalorder %s29_s27, %s3178_s8  ;;  %p3184_p13 = scmp.lt.s32.totalorder %s3178_s8, %s3178_s8 }
  0x1d   :  { %p3185_p0 = por %p3184_p13, %p3183_p12 }
  0x1f   :  { %p3186_p1 = pnand %p3185_p0, %p3179_p11 }
  0x21   :  { %3189 = shalt.err (!%p3186_p1)
}
  0x22   :  { %34 = dma.hbm_to_vmem [thread:$0]  %s3915_s1, 3072, %s29_s27, [#allocation7], %s3219_s22, %s3219_s22, %s3220_s23  }
  0x23   :  { %3212 = dma.done.wait [#allocation4], 512  }
  0x24   :  { %3213 = vsyncadd [#allocation4], 4294966784 }
  0x25   :  { %3214 = dma.done.wait [#allocation7], 3072  }
  0x26   :  { %3215 = vsyncadd [#allocation7], 4294964224  ;;  %vm43_vm0 = vcmask 516096   ;;  %v3222_v0 = vmov 0.0   ;;  %v75_v1 = vld [vmem:[#allocation6 + $0x40] sm:$0xff]  ;;  %v76_v2 = vld [vmem:[#allocation6 + $0x48] sm:$0xff] }
  0x27   :  { %44 = vst.msk [vmem:[#allocation2 + $0x7] sm:$0x1] %vm43_vm0, %v3222_v0  ;;  %45 = vst.msk [vmem:[#allocation2 + $0x18] sm:$0x1] %vm43_vm0, %v3222_v0  ;;  %v62_v3 = vld [vmem:[#allocation6] sm:$0xff]  ;;  %vm51_vm1 = vcmask 523264  }
  0x28   :  { %47 = vst.msk [vmem:[#allocation2 + $0x27] sm:$0x1] %vm43_vm0, %v3222_v0  ;;  %48 = vst.msk [vmem:[#allocation2 + $0x38] sm:$0x1] %vm43_vm0, %v3222_v0  ;;  %v96_v4 = vand.u32 4294901760, %v75_v1  ;;  %v99_v5 = vand.u32 4294901760, %v76_v2 }
  0x29   :  { %v63_v6 = vld [vmem:[#allocation6 + $0x8] sm:$0xff]  ;;  %v774_v7 = vand.u32 4294901760, %v62_v3  ;;  %v77_v8 = vld [vmem:[#allocation6 + $0x50] sm:$0xff]  ;;  %v78_v9 = vld [vmem:[#allocation6 + $0x58] sm:$0xff]  ;;  %s3223_s11 = smov [#allocation8]  }
  0x2a   :  { %v777_v10 = vand.u32 4294901760, %v63_v6  ;;  %v102_v11 = vand.u32 4294901760, %v77_v8  ;;  %v105_v12 = vand.u32 4294901760, %v78_v9  ;;  %v64_v13 = vld [vmem:[#allocation6 + $0x10] sm:$0xff]  ;;  %v65_v14 = vld [vmem:[#allocation6 + $0x18] sm:$0xff]  ;;  %v3274_v15 = vld [vmem:[#allocation6 + $0x60] sm:$0xff]  ;;  %v3276_v16 = vpack.c.bf16 %v99_v5, %v96_v4 }
  0x2b   :  { %v780_v17 = vand.u32 4294901760, %v64_v13  ;;  %v783_v18 = vand.u32 4294901760, %v65_v14  ;;  %v3278_v19 = vld [vmem:[#allocation6 + $0x68] sm:$0xff]  ;;  %v108_v20 = vand.u32 4294901760, %v3274_v15  ;;  %v3281_v21 = vld [vmem:[#allocation6 + $0x20] sm:$0xff]  ;;  %v3291_v27 = vld [vmem:[#allocation6 + $0x70] sm:$0xff]  ;;  %v3312_v38 = vsub.f32 %v75_v1, %v96_v4 }
  0x2c   :  { %v3283_v22 = vld [vmem:[#allocation6 + $0x28] sm:$0xff]  ;;  %v3285_v23 = vpack.c.bf16 %v777_v10, %v774_v7  ;;  %v3287_v24 = vpack.c.bf16 %v105_v12, %v102_v11  ;;  %v111_v25 = vand.u32 4294901760, %v3278_v19  ;;  %v786_v26 = vand.u32 4294901760, %v3281_v21  ;;  %v3293_v28 = vld [vmem:[#allocation6 + $0x78] sm:$0xff]  ;;  %v3295_v29 = vld [vmem:[#allocation6 + $0x30] sm:$0xff]  ;;  %2785 = vmatprep.subr.bf16.mxu1 %v3276_v16  ;;  %s2158_s12 = sshll.u32 %s3223_s11, 4  ;;  %s2159_s12 = int_to_ptr.vmem [resolvable:$true] %s2158_s12 }
  0x2d   :  { %v3298_v30 = vpack.c.bf16 %v783_v18, %v780_v17  ;;  %v789_v31 = vand.u32 4294901760, %v3283_v22  ;;  %v114_v32 = vand.u32 4294901760, %v3291_v27  ;;  %v117_v33 = vand.u32 4294901760, %v3293_v28  ;;  %v3303_v34 = vld [vmem:[#allocation6 + $0x38] sm:$0xff]  ;;  %v49_v35 = vld [vmem:[#allocation3] sm:$0xff]  ;;  %v50_v36 = vld [vmem:[#allocation3 + $0x8] sm:$0xff]  ;;  %2787 = vmatpush3.bf16.msra.mxu1 %v3276_v16  ;;  %p3195_p3 = scmp.lt.s32.totalorder %s2159_s12, %s2159_s12 }
  0x2e   :  { %3971 = vst [vmem:[#allocation12_spill] sm:$0xff] %v3285_v23  ;;  %2929 = vmatprep.subr.bf16.mxu0 %v3285_v23  ;;  %v3309_v37 = vpack.c.bf16 %v111_v25, %v108_v20  ;;  %52 = vst.msk [vmem:[#allocation2 + $0x8] sm:$0xff] %vm51_vm1, %v49_v35  ;;  %v54_v39 = vld [vmem:[#allocation3 + $0x10] sm:$0xff]  ;;  %v55_v40 = vld [vmem:[#allocation3 + $0x18] sm:$0xff]  ;;  %2789 = vmatprep.subr.bf16.mxu1 %v3287_v24  ;;  %v792_v42 = vand.u32 4294901760, %v3295_v29  ;;  %v795_v43 = vand.u32 4294901760, %v3303_v34 }
  0x2f   :  { %3972 = vst [vmem:[#allocation13_spill] sm:$0xff] %v3298_v30  ;;  %53 = vst.msk [vmem:[#allocation2 + $0x10] sm:$0xff] %vm51_vm1, %v50_v36  ;;  %2931 = vmatpush3.bf16.msra.mxu0 %v3285_v23  ;;  %v3321_v41 = vpack.c.bf16 %v789_v31, %v786_v26  ;;  %v3325_v44 = vsub.f32 %v76_v2, %v99_v5  ;;  %v3334_v45 = vpack.c.bf16 %v117_v33, %v114_v32 }
  0x30   :  { %56 = vst.msk [vmem:[#allocation2 + $0x28] sm:$0xff] %vm51_vm1, %v54_v39  ;;  %57 = vst.msk [vmem:[#allocation2 + $0x30] sm:$0xff] %vm51_vm1, %v55_v40  ;;  %2933 = vmatprep.subr.bf16.mxu0 %v3298_v30  ;;  %v3932_v46 = vand.u32 4294901760, %v3312_v38  ;;  %v3337_v47 = vsub.f32 %v62_v3, %v774_v7  ;;  %v3339_v48 = vsub.f32 %v63_v6, %v777_v10 }
  0x31   :  { %3973 = vst [vmem:[#allocation14_spill] sm:$0xff] %v3321_v41  ;;  %v3924_v49 = vand.u32 4294901760, %v3325_v44  ;;  %v3342_v50 = vsub.f32 %v77_v8, %v102_v11  ;;  %v3344_v51 = vsub.f32 %v78_v9, %v105_v12  ;;  %v3346_v52 = vsub.f32 %v64_v13, %v780_v17  ;;  %2791 = vmatpush3.bf16.msra.mxu1 %v3287_v24 }
  0x32   :  { %v212_v53 = vsub.f32 %v3312_v38, %v3932_v46  ;;  %v3941_v54 = vand.u32 4294901760, %v3337_v47  ;;  %v3940_v55 = vand.u32 4294901760, %v3339_v48  ;;  %v3354_v56 = vsub.f32 %v65_v14, %v783_v18  ;;  %2793 = vmatprep.subr.bf16.mxu1 %v3309_v37  ;;  %v3552_v46 = vld [vmem:[#allocation6 + $0xb8] sm:$0xff] }
  0x33   :  { %2935 = vmatpush3.bf16.msra.mxu0 %v3298_v30  ;;  %v3362_v57 = vpack.c.bf16 %v795_v43, %v792_v42  ;;  %v219_v58 = vsub.f32 %v3325_v44, %v3924_v49  ;;  %v3923_v59 = vand.u32 4294901760, %v3342_v50  ;;  %v3921_v60 = vand.u32 4294901760, %v3344_v51 }
  0x34   :  { %2937 = vmatprep.subr.bf16.mxu0 %v3321_v41  ;;  %v213_v61 = vand.u32 4294901760, %v212_v53  ;;  %v3939_v62 = vand.u32 4294901760, %v3346_v52  ;;  %v3938_v63 = vand.u32 4294901760, %v3354_v56  ;;  %v3373_v0 = vsub.f32 %v3274_v15, %v108_v20 }
  0x35   :  { %3974 = vst [vmem:[#allocation15_spill] sm:$0xff] %v3362_v57  ;;  %v70_v1 = vld [vmem:[#allocation2 + $0x8] sm:$0xff]  ;;  %v220_v2 = vand.u32 4294901760, %v219_v58  ;;  %v2944_v4 = vpack.c.bf16 %v3940_v55, %v3941_v54  ;;  %v226_v6 = vsub.f32 %v3342_v50, %v3923_v59  ;;  %2795 = vmatpush3.bf16.msra.mxu1 %v3309_v37  ;;  %v3389_v11 = vsub.f32 %v3278_v19, %v111_v25 }
  0x36   :  { %v58_v3 = vld [vmem:[#allocation2 + $0x7] sm:$0xff]  ;;  %v71_v5 = vld [vmem:[#allocation2 + $0x10] sm:$0xff]  ;;  %v84_v7 = vsel %vm51_vm1, %v70_v1, 0  ;;  %2797 = vmatprep.subr.bf16.mxu1 %v3334_v45  ;;  %v233_v18 = vsub.f32 %v3344_v51, %v3921_v60  ;;  %v2948_v19 = vpack.c.bf16 %v3938_v63, %v3939_v62  ;;  %v3919_v20 = vand.u32 4294901760, %v3373_v0 }
  0x37   :  { %v762_v8 = vsel %vm51_vm1, %v58_v3, 0  ;;  %v87_v9 = vsel %vm51_vm1, %v71_v5, 0  ;;  %v59_v10 = vld [vmem:[#allocation2 + $0xf] sm:$0xff]  ;;  %2939 = vmatpush3.bf16.msra.mxu0 %v3321_v41  ;;  %v3393_v12 = vand.u32 4294901760, %v84_v7  ;;  %v2800_v13 = vpack.c.bf16 %v220_v2, %v213_v61 }
  0x38   :  { %v3395_v14 = vand.u32 4294901760, %v762_v8  ;;  %v3397_v15 = vand.u32 4294901760, %v87_v9  ;;  %2941 = vmatprep.subr.bf16.mxu0 %v3362_v57  ;;  %v765_v17 = vsel %vm51_vm1, %v59_v10, 0  ;;  %v227_v40 = vand.u32 4294901760, %v226_v6  ;;  %v72_v6 = vld [vmem:[#allocation2 + $0x28] sm:$0xff] }
  0x39   :  { %v3410_v25 = vsub.f32 %v84_v7, %v3393_v12  ;;  %v3418_v39 = vand.u32 4294901760, %v765_v17  ;;  %2799 = vmatpush3.bf16.msra.mxu1 %v3334_v45  ;;  %v240_v53 = vsub.f32 %v3373_v0, %v3919_v20  ;;  %v3918_v58 = vand.u32 4294901760, %v3389_v11  ;;  %v60_v20 = vld [vmem:[#allocation2 + $0x27] sm:$0xff] }
  0x3a   :  { %3975 = vst [vmem:[#allocation16_spill] sm:$0xff] %v3395_v14  ;;  %3976 = vst [vmem:[#allocation17_spill] sm:$0xff] %v3397_v15  ;;  %v3413_v35 = vsub.f32 %v762_v8, %v3395_v14  ;;  %v3416_v36 = vsub.f32 %v87_v9, %v3397_v15  ;;  %v3428_v61 = vsub.f32 %v3281_v21, %v786_v26  ;;  %2801 = vmatprep.subr.bf16.mxu1 %v2800_v13 }
  0x3b   :  { %3978 = vst [vmem:[#allocation19_spill] sm:$0xff] %v3418_v39  ;;  %2943 = vmatpush3.bf16.msra.mxu0 %v3362_v57  ;;  %v3933_v1 = vand.u32 4294901760, %v3410_v25  ;;  %v3435_v5 = vsub.f32 %v765_v17, %v3418_v39  ;;  %v234_v7 = vand.u32 4294901760, %v233_v18  ;;  %v241_v8 = vand.u32 4294901760, %v240_v53 }
  0x3c   :  { %3977 = vst [vmem:[#allocation18_spill] sm:$0xff] %v3413_v35  ;;  %v3920_v2 = vand.u32 4294901760, %v3413_v35  ;;  %v3922_v3 = vand.u32 4294901760, %v3416_v36  ;;  %2945 = vmatprep.subr.bf16.mxu0 %v2944_v4  ;;  %v247_v21 = vsub.f32 %v3389_v11, %v3918_v58  ;;  %v3443_v26 = vsub.f32 %v3283_v22, %v789_v31 }
  0x3d   :  { %3979 = vst [vmem:[#allocation20_spill] sm:$0xff] %v3435_v5  ;;  %v171_v9 = vsub.f32 %v3410_v25, %v3933_v1  ;;  %v3925_v17 = vand.u32 4294901760, %v3435_v5  ;;  %v3937_v18 = vand.u32 4294901760, %v3428_v61  ;;  %v90_v22 = vsel %vm51_vm1, %v72_v6, 0 }
  0x3e   :  { %2602 = vmatprep.mubr.f32.mxu0 %v3920_v2  ;;  %v181_v10 = vsub.f32 %v3416_v36, %v3922_v3  ;;  %v248_v53 = vand.u32 4294901760, %v247_v21  ;;  %v3936_v58 = vand.u32 4294901760, %v3443_v26  ;;  %v3460_v31 = vsub.f32 %v3291_v27, %v114_v32  ;;  %v73_v27 = vld [vmem:[#allocation2 + $0x30] sm:$0xff] }
  0x3f   :  { %v172_v2 = vand.u32 4294901760, %v171_v9  ;;  %2603 = vmatmul.mubr.f32.vlgmr.msra.gmra.mrb[0].mxu0 %v3925_v17  ;;  %v3464_v3 = vand.u32 4294901760, %v90_v22  ;;  %v2804_v59 = vpack.c.bf16 %v234_v7, %v227_v40  ;;  %v3470_v6 = vsub.f32 %v3293_v28, %v117_v33  ;;  %v61_v32 = vld [vmem:[#allocation2 + $0x2f] sm:$0xff] }
  0x40   :  { %v182_v60 = vand.u32 4294901760, %v181_v10  ;;  %2947 = vmatpush3.bf16.msra.mxu0 %v2944_v4  ;;  %v2808_v21 = vpack.c.bf16 %v248_v53, %v241_v8  ;;  %v3927_v49 = vand.u32 4294901760, %v3460_v31  ;;  %v2952_v9 = vpack.c.bf16 %v3936_v58, %v3937_v18 }
  0x41   :  { %3980 = vst [vmem:[#allocation21_spill] sm:$0xff] %v3464_v3  ;;  %2404 = vmatprep.mubr.f32.mxu1 %v172_v2  ;;  %2949 = vmatprep.subr.bf16.mxu0 %v2948_v19  ;;  %v3477_v4 = vsub.f32 %v90_v22, %v3464_v3  ;;  %v768_v40 = vsel %vm51_vm1, %v60_v20, 0  ;;  %v3483_v7 = vsub.f32 %v3295_v29, %v792_v42  ;;  %v3926_v33 = vand.u32 4294901760, %v3470_v6 }
  0x42   :  { %2405 = vmatmul.mubr.f32.vlgmr.msra.gmra.mrb[0].mxu1 %v182_v60  ;;  %v254_v28 = vsub.f32 %v3460_v31, %v3927_v49  ;;  %v3489_v2 = vand.u32 4294901760, %v768_v40  ;;  %v3494_v8 = vsub.f32 %v3303_v34, %v795_v43  ;;  %v93_v42 = vsel %vm51_vm1, %v73_v27, 0 }
  0x43   :  { %2803 = vmatpush3.bf16.msra.mxu1 %v2800_v13  ;;  %v3928_v20 = vand.u32 4294901760, %v3477_v4  ;;  %v3935_v29 = vand.u32 4294901760, %v3483_v7  ;;  %v771_v60 = vsel %vm51_vm1, %v61_v32, 0  ;;  %v261_v53 = vsub.f32 %v3470_v6, %v3926_v33 }
  0x44   :  { %3981 = vst [vmem:[#allocation22_spill] sm:$0xff] %v3489_v2  ;;  %2805 = vmatprep.subr.bf16.mxu1 %v2804_v59  ;;  %2951 = vmatpush3.bf16.msra.mxu0 %v2948_v19  ;;  %v255_v10 = vand.u32 4294901760, %v254_v28  ;;  %v3504_v22 = vsub.f32 %v768_v40, %v3489_v2  ;;  %v3934_v34 = vand.u32 4294901760, %v3494_v8  ;;  %v3510_v13 = vand.u32 4294901760, %v93_v42 }
  0x45   :  { %2953 = vmatprep.subr.bf16.mxu0 %v2952_v9  ;;  %v191_v43 = vsub.f32 %v3477_v4, %v3928_v20  ;;  %v3512_v27 = vand.u32 4294901760, %v771_v60  ;;  %v262_v19 = vand.u32 4294901760, %v261_v53  ;;  %v3992_v35 = vand.u32 4294901760, %v3346_v52 }
  0x46   :  { %3982 = vst [vmem:[#allocation23_spill] sm:$0xff] %v3504_v22  ;;  %3983 = vst [vmem:[#allocation24_spill] sm:$0xff] %v3510_v13  ;;  %v3930_v32 = vand.u32 4294901760, %v3504_v22  ;;  %v2956_v40 = vpack.c.bf16 %v3934_v34, %v3935_v29  ;;  %v3520_v17 = vsub.f32 %v93_v42, %v3510_v13  ;;  %v2824_v34 = vpack.c.bf16 %v3389_v11, %v3373_v0 }
  0x47   :  { %2807 = vmatpush3.bf16.msra.mxu1 %v2804_v59  ;;  %v192_v28 = vand.u32 4294901760, %v191_v43  ;;  %v3523_v33 = vsub.f32 %v771_v60, %v3512_v27  ;;  %v2812_v49 = vpack.c.bf16 %v262_v19, %v255_v10  ;;  %v2816_v60 = vpack.c.bf16 %v3325_v44, %v3312_v38  ;;  %v1444_v10 = vld [vmem:[#allocation6 + $0x80] sm:$0xff] }
  0x48   :  { %2809 = vmatprep.subr.bf16.mxu1 %v2808_v21  ;;  %2955 = vmatpush3.bf16.msra.mxu0 %v2952_v9  ;;  %v3931_v53 = vand.u32 4294901760, %v3520_v17  ;;  %v1439_v9 = vld [vmem:[#allocation2 + $0x9] sm:$0xff]  ;;  %v2820_v19 = vpack.c.bf16 %v3344_v51, %v3342_v50 }
  0x49   :  { %3984 = vst [vmem:[#allocation25_spill] sm:$0xff] %v3523_v33  ;;  %2407 = vmatprep.mubr.f32.mxu1 %v192_v28  ;;  %2605 = vmatprep.mubr.f32.mxu0 %v3930_v32  ;;  %v3929_v20 = vand.u32 4294901760, %v3523_v33  ;;  %v1453_v43 = vsel %vm51_vm1, %v1439_v9, 0  ;;  %v1446_v28 = vld [vmem:[#allocation6 + $0x90] sm:$0xff]  ;;  %v1449_v9 = vld [vmem:[#allocation6 + $0xa8] sm:$0xff] }
  0x4a   :  { %2957 = vmatprep.subr.bf16.mxu0 %v2956_v40  ;;  %v201_v59 = vsub.f32 %v3520_v17, %v3931_v53  ;;  %v3546_v32 = vand.u32 4294901760, %v1453_v43  ;;  %v3550_v53 = vld [vmem:[#allocation6 + $0xb0] sm:$0xff]  ;;  %v1471_v58 = vand.u32 4294901760, %v1446_v28 }
  0x4b   :  { %2811 = vmatpush3.bf16.msra.mxu1 %v2808_v21  ;;  %2606 = vmatmul.mubr.f32.gmra.mrb[2].mxu0 %v3929_v20  ;;  %v1445_v21 = vld [vmem:[#allocation6 + $0x88] sm:$0xff]  ;;  %v1448_v20 = vld [vmem:[#allocation6 + $0xa0] sm:$0xff] }
  0x4c   :  { %2813 = vmatprep.subr.bf16.mxu1 %v2812_v49  ;;  %2959 = vmatpush3.bf16.msra.mxu0 %v2956_v40  ;;  %v202_v42 = vand.u32 4294901760, %v201_v59  ;;  %v1465_v40 = vand.u32 4294901760, %v1444_v10  ;;  %v1468_v59 = vand.u32 4294901760, %v1445_v21  ;;  %v1477_v63 = vand.u32 4294901760, %v1448_v20 }
  0x4d   :  { %2624 = vmatprep.mubr.f32.mxu0 %v3395_v14  ;;  %2961 = vmatprep.subr.bf16.mxu0 %v3285_v23 }
  0x4e   :  { %2408 = vmatmul.mubr.f32.gmra.mrb[2].mxu1 %v202_v42  ;;  %v1447_v42 = vld [vmem:[#allocation6 + $0x98] sm:$0xff]  ;;  %v3554_v1 = vsub.f32 %v1444_v10, %v1465_v40  ;;  %v3559_v29 = vsub.f32 %v1445_v21, %v1468_v59  ;;  %v3568_v21 = vsub.f32 %v1453_v43, %v3546_v32  ;;  %v1441_v10 = vld [vmem:[#allocation2 + $0x29] sm:$0xff]  ;;  %v2828_v43 = vpack.c.bf16 %v3470_v6, %v3460_v31 }
  0x4f   :  { %2625 = vmatmul.mubr.f32.vlgmr.msra.gmra.mrb[0].mxu0 %v3418_v39  ;;  %2815 = vmatpush3.bf16.msra.mxu1 %v2812_v49  ;;  %v1440_v49 = vld [vmem:[#allocation2 + $0x11] sm:$0xff]  ;;  %v1474_v18 = vand.u32 4294901760, %v1447_v42  ;;  %v3583_v55 = vpack.c.bf16 %v1468_v59, %v1465_v40 }
  0x50   :  { %2426 = vmatprep.mubr.f32.mxu1 %v3393_v12  ;;  %2817 = vmatprep.subr.bf16.mxu1 %v2816_v60  ;;  %v1456_v62 = vsel %vm51_vm1, %v1440_v49, 0  ;;  %3985 = vst [vmem:[#allocation26_spill] sm:$0xff] %v3568_v21 }
  0x51   :  { %2963 = vmatpush3.bf16.msra.mxu0 %v3285_v23  ;;  %2627 = vmatprep.mubr.f32.mxu0 %v3489_v2  ;;  %v3574_v33 = vand.u32 4294901760, %v1456_v62  ;;  %v3578_v22 = vsub.f32 %v1447_v42, %v1474_v18  ;;  %v3588_v49 = vpack.c.bf16 %v1474_v18, %v1471_v58  ;;  %v3987_v42 = vand.u32 4294901760, %v3552_v46  ;;  %v1442_v23 = vld [vmem:[#allocation2 + $0x31] sm:$0xff] }
  0x52   :  { %2965 = vmatprep.subr.bf16.mxu0 %v3298_v30  ;;  %2427 = vmatmul.mubr.f32.vlgmr.msra.gmra.mrb[0].mxu1 %v3397_v15  ;;  %v3990_v18 = vand.u32 4294901760, %v3339_v48 }
  0x53   :  { %2628 = vmatmul.mubr.f32.gmra.mrb[2].mxu0 %v3512_v27  ;;  %2819 = vmatpush3.bf16.msra.mxu1 %v2816_v60  ;;  %v1480_v60 = vand.u32 4294901760, %v1449_v9 }
  0x54   :  { %2429 = vmatprep.mubr.f32.mxu1 %v3464_v3  ;;  %2821 = vmatprep.subr.bf16.mxu1 %v2820_v19  ;;  %v897_v59 = vsub.f32 %v3339_v48, %v3990_v18 }
  0x55   :  { %2967 = vmatpush3.bf16.msra.mxu0 %v3298_v30  ;;  %2646 = vmatprep.mubr.f32.mxu0 %v3395_v14  ;;  %v3576_v14 = vsub.f32 %v1446_v28, %v1471_v58  ;;  %v3590_v54 = vpack.c.bf16 %v1480_v60, %v1477_v63  ;;  %v3986_v28 = vand.u32 4294901760, %v3550_v53  ;;  %v3988_v30 = vand.u32 4294901760, %v3554_v1 }
  0x56   :  { %2969 = vmatprep.subr.bf16.mxu0 %v3321_v41  ;;  %2430 = vmatmul.mubr.f32.gmra.mrb[2].mxu1 %v3510_v13  ;;  %v3989_v58 = vand.u32 4294901760, %v3337_v47  ;;  %v3630_v13 = vsub.f32 %v1449_v9, %v1480_v60 }
  0x57   :  { %2823 = vmatpush3.bf16.msra.mxu1 %v2820_v19  ;;  %2448 = vmatprep.mubr.f32.mxu1 %v3410_v25  ;;  %v3585_v19 = vsub.f32 %v1448_v20, %v1477_v63  ;;  %v3596_v5 = vpack.c.bf16 %v3987_v42, %v3986_v28  ;;  %v3602_v40 = vsub.f32 %v3554_v1, %v3988_v30  ;;  %v1459_v20 = vsel %vm51_vm1, %v1441_v10, 0 }
  0x58   :  { %2825 = vmatprep.subr.bf16.mxu1 %v2824_v34  ;;  %v890_v63 = vsub.f32 %v3337_v47, %v3989_v58  ;;  %v3991_v28 = vand.u32 4294901760, %v3559_v29  ;;  %v3632_v10 = vand.u32 4294901760, %v1459_v20 }
  0x59   :  { %2971 = vmatpush3.bf16.msra.mxu0 %v3321_v41  ;;  %v3617_v41 = vsub.f32 %v1456_v62, %v3574_v33  ;;  %v3993_v62 = vand.u32 4294901760, %v3568_v21  ;;  %v1582_v9 = vand.u32 4294901760, %v3602_v40 }
  0x5a   :  { %2973 = vmatprep.subr.bf16.mxu0 %v3362_v57  ;;  %v3614_v42 = vsub.f32 %v3559_v29, %v3991_v28  ;;  %v891_v18 = vand.u32 4294901760, %v890_v63  ;;  %v904_v28 = vsub.f32 %v3346_v52, %v3992_v35  ;;  %v1462_v63 = vsel %vm51_vm1, %v1442_v23, 0 }
  0x5b   :  { %2827 = vmatpush3.bf16.msra.mxu1 %v2824_v34  ;;  %v898_v34 = vand.u32 4294901760, %v897_v59  ;;  %v1540_v30 = vsub.f32 %v3568_v21, %v3993_v62  ;;  %v3995_v35 = vand.u32 4294901760, %v3428_v61  ;;  %v3996_v21 = vand.u32 4294901760, %v3443_v26 }
  0x5c   :  { %2829 = vmatprep.subr.bf16.mxu1 %v2828_v43  ;;  %v905_v3 = vand.u32 4294901760, %v904_v28  ;;  %v3997_v23 = vand.u32 4294901760, %v3576_v14  ;;  %v3999_v28 = vand.u32 4294901760, %v3494_v8 }
  0x5d   :  { %2975 = vmatpush3.bf16.msra.mxu0 %v3362_v57  ;;  %v3994_v57 = vand.u32 4294901760, %v3354_v56  ;;  %v3638_v59 = vpack.c.bf16 %v898_v34, %v891_v18  ;;  %v918_v15 = vsub.f32 %v3428_v61, %v3995_v35  ;;  %v3998_v34 = vand.u32 4294901760, %v3483_v7 }
  0x5e   :  { %2977 = vmatprep.subr.bf16.mxu0 %v3583_v55  ;;  %v1595_v18 = vsub.f32 %v3576_v14, %v3997_v23  ;;  %v3665_v35 = vand.u32 4294901760, %v1462_v63  ;;  %v1541_v23 = vand.u32 4294901760, %v1540_v30  ;;  %v3685_v30 = vpack.c.bf16 %v3443_v26, %v3428_v61 }
  0x5f   :  { %v911_v58 = vsub.f32 %v3354_v56, %v3994_v57  ;;  %2831 = vmatpush3.bf16.msra.mxu1 %v2828_v43  ;;  %v925_v57 = vsub.f32 %v3443_v26, %v3996_v21  ;;  %v919_v43 = vand.u32 4294901760, %v918_v15  ;;  %v932_v40 = vsub.f32 %v3483_v7, %v3998_v34 }
  0x60   :  { %2647 = vmatmul.mubr.f32.vlgmr.msra.gmra.mrb[0].mxu0 %v3418_v39  ;;  %2833 = vmatprep.subr.bf16.mxu1 %v3276_v16  ;;  %v3663_v21 = vsub.f32 %v1459_v20, %v3632_v10  ;;  %v1589_v20 = vand.u32 4294901760, %v3614_v42  ;;  %v1615_v42 = vand.u32 4294901760, %v3630_v13  ;;  %v4001_v61 = vand.u32 4294901760, %v3550_v53 }
  0x61   :  { %v912_v62 = vand.u32 4294901760, %v911_v58  ;;  %2979 = vmatpush3.bf16.msra.mxu0 %v3583_v55  ;;  %v939_v58 = vsub.f32 %v3494_v8, %v3999_v28  ;;  %2649 = vmatprep.mubr.f32.mxu0 %v3489_v2  ;;  %v926_v15 = vand.u32 4294901760, %v925_v57  ;;  %v933_v34 = vand.u32 4294901760, %v932_v40 }
  0x62   :  { %2981 = vmatprep.subr.bf16.mxu0 %v3588_v49  ;;  %2449 = vmatmul.mubr.f32.vlgmr.msra.gmra.mrb[0].mxu1 %v3416_v36  ;;  %v3672_v28 = vpack.c.bf16 %v3339_v48, %v3337_v47  ;;  %v4000_v47 = vand.u32 4294901760, %v3578_v22  ;;  %v3705_v26 = vsub.f32 %v3550_v53, %v4001_v61  ;;  %v4002_v57 = vand.u32 4294901760, %v3552_v46 }
  0x63   :  { %v3667_v60 = vpack.c.bf16 %v912_v62, %v905_v3  ;;  %v940_v39 = vand.u32 4294901760, %v939_v58  ;;  %2835 = vmatpush3.bf16.msra.mxu1 %v3276_v16  ;;  %2451 = vmatprep.mubr.f32.mxu1 %v3477_v4  ;;  %v3677_v2 = vpack.c.bf16 %v926_v15, %v919_v43  ;;  %v3681_v3 = vpack.c.bf16 %v3354_v56, %v3346_v52 }
  0x64   :  { %2837 = vmatprep.subr.bf16.mxu1 %v3287_v24  ;;  %v1602_v48 = vsub.f32 %v3578_v22, %v4000_v47  ;;  %v3697_v52 = vpack.c.bf16 %v3494_v8, %v3483_v7  ;;  %2650 = vmatmul.mubr.f32.gmra.mrb[2].mxu0 %v3512_v27  ;;  %v3969_v56 = vand.u32 4294901760, %v3663_v21  ;;  %v3713_v43 = vsub.f32 %v1462_v63, %v3665_v35 }
  0x65   :  { %2983 = vmatpush3.bf16.msra.mxu0 %v3588_v49  ;;  %v3693_v62 = vpack.c.bf16 %v940_v39, %v933_v34  ;;  %v3710_v39 = vsub.f32 %v3552_v46, %v4002_v57  ;;  %2668 = vmatprep.mubr.f32.mxu0 %v1541_v23  ;;  %v4003_v7 = vand.u32 4294901760, %v3410_v25  ;;  %v4004_v8 = vand.u32 4294901760, %v3617_v41 }
  0x66   :  { %2985 = vmatprep.subr.bf16.mxu0 %v3590_v54  ;;  %2452 = vmatmul.mubr.f32.gmra.mrb[2].mxu1 %v3520_v17  ;;  %v4005_v40 = vand.u32 4294901760, %v3585_v19  ;;  %v2992_v63 = vpack.c.bf16 %v1589_v20, %v1582_v9  ;;  %v1596_v58 = vand.u32 4294901760, %v1595_v18  ;;  %v1603_v15 = vand.u32 4294901760, %v1602_v48 }
  0x67   :  { %2839 = vmatpush3.bf16.msra.mxu1 %v3287_v24  ;;  %2470 = vmatprep.mubr.f32.mxu1 %v4003_v7  ;;  %v1550_v53 = vsub.f32 %v3617_v41, %v4004_v8  ;;  %v1616_v25 = vsub.f32 %v3630_v13, %v1615_v42  ;;  %v1560_v23 = vsub.f32 %v3663_v21, %v3969_v56  ;;  %v1622_v34 = vand.u32 4294901760, %v3705_v26 }
  0x68   :  { %v1609_v46 = vsub.f32 %v3585_v19, %v4005_v40  ;;  %2841 = vmatprep.subr.bf16.mxu1 %v3309_v37  ;;  %v1629_v47 = vand.u32 4294901760, %v3710_v39  ;;  %v3970_v61 = vand.u32 4294901760, %v3713_v43  ;;  %v4006_v18 = vand.u32 4294901760, %v3312_v38 }
  0x69   :  { %2987 = vmatpush3.bf16.msra.mxu0 %v3590_v54  ;;  %v1551_v9 = vand.u32 4294901760, %v1550_v53  ;;  %v4007_v20 = vand.u32 4294901760, %v3325_v44  ;;  %v2996_v57 = vpack.c.bf16 %v1603_v15, %v1596_v58  ;;  %v1617_v8 = vand.u32 4294901760, %v1616_v25 }
  0x6a   :  { %2989 = vmatprep.subr.bf16.mxu0 %v3596_v5  ;;  %v1610_v7 = vand.u32 4294901760, %v1609_v46  ;;  %v1561_v40 = vand.u32 4294901760, %v1560_v23  ;;  %v1623_v56 = vsub.f32 %v3705_v26, %v1622_v34  ;;  %v1630_v53 = vsub.f32 %v3710_v39, %v1629_v47 }
  0x6b   :  { %2843 = vmatpush3.bf16.msra.mxu1 %v3309_v37  ;;  %v2848_v48 = vpack.c.bf16 %v4007_v20, %v4006_v18  ;;  %v1570_v38 = vsub.f32 %v3713_v43, %v3970_v61  ;;  %v4008_v44 = vand.u32 4294901760, %v3342_v50  ;;  %v4009_v46 = vand.u32 4294901760, %v3344_v51 }
  0x6c   :  { %2845 = vmatprep.subr.bf16.mxu1 %v3334_v45  ;;  %v3000_v15 = vpack.c.bf16 %v1617_v8, %v1610_v7  ;;  %v1624_v25 = vand.u32 4294901760, %v1623_v56  ;;  %v1631_v23 = vand.u32 4294901760, %v1630_v53  ;;  %v4010_v20 = vand.u32 4294901760, %v3416_v36  ;;  %v4020_v7 = vld [vmem:[#allocation26_spill] sm:$0xff] }
  0x6d   :  { %2991 = vmatpush3.bf16.msra.mxu0 %v3596_v5  ;;  %v2852_v58 = vpack.c.bf16 %v4009_v46, %v4008_v44  ;;  %v1571_v18 = vand.u32 4294901760, %v1570_v38  ;;  %v4011_v61 = vand.u32 4294901760, %v3477_v4  ;;  %v4012_v50 = vand.u32 4294901760, %v3373_v0  ;;  %v4026_v53 = vld [vmem:[#allocation14_spill] sm:$0xff] }
  0x6e   :  { %2993 = vmatprep.subr.bf16.mxu0 %v2992_v63  ;;  %v4013_v51 = vand.u32 4294901760, %v3389_v11  ;;  %v4014_v56 = vand.u32 4294901760, %v3520_v17  ;;  %v4015_v36 = vand.u32 4294901760, %v3460_v31  ;;  %v4016_v0 = vand.u32 4294901760, %v3470_v6  ;;  %v4017_v6 = vld [vmem:[#allocation17_spill] sm:$0xff] }
  0x6f   :  { %2847 = vmatpush3.bf16.msra.mxu1 %v3334_v45  ;;  %v3008_v11 = vpack.c.bf16 %v3559_v29, %v3554_v1  ;;  %v3012_v17 = vpack.c.bf16 %v3578_v22, %v3576_v14  ;;  %v3016_v31 = vpack.c.bf16 %v3630_v13, %v3585_v19  ;;  %v4027_v38 = vand.u32 4294901760, %v3554_v1 }
  0x70   :  { %2669 = vmatmul.mubr.f32.vlgmr.msra.gmra.mrb[0].mxu0 %v1551_v9  ;;  %2849 = vmatprep.subr.bf16.mxu1 %v2848_v48  ;;  %v3004_v9 = vpack.c.bf16 %v1631_v23, %v1624_v25  ;;  %v2860_v4 = vpack.c.bf16 %v4016_v0, %v4015_v36  ;;  %v4028_v44 = vand.u32 4294901760, %v3559_v29  ;;  %v4031_v23 = vld [vmem:[#allocation23_spill] sm:$0xff]  ;;  %v4034_v1 = vand.u32 4294901760, %v3576_v14 }
  0x71   :  { %2995 = vmatpush3.bf16.msra.mxu0 %v2992_v63  ;;  %2671 = vmatprep.mubr.f32.mxu0 %v1561_v40  ;;  %v2856_v63 = vpack.c.bf16 %v4013_v51, %v4012_v50  ;;  %v4033_v50 = vld [vmem:[#allocation15_spill] sm:$0xff]  ;;  %v4035_v29 = vand.u32 4294901760, %v3578_v22  ;;  %v4038_v0 = vand.u32 4294901760, %v3617_v41  ;;  %v4039_v14 = vand.u32 4294901760, %v3585_v19  ;;  %v4042_v19 = vld [vmem:[#allocation16_spill] sm:$0xff] }
  0x72   :  { %2997 = vmatprep.subr.bf16.mxu0 %v2996_v57  ;;  %2471 = vmatmul.mubr.f32.vlgmr.msra.gmra.mrb[0].mxu1 %v4010_v20  ;;  %v3040_v46 = vpack.c.bf16 %v4028_v44, %v4027_v38  ;;  %v4041_v13 = vand.u32 4294901760, %v3713_v43 }
  0x73   :  { %2851 = vmatpush3.bf16.msra.mxu1 %v2848_v48  ;;  %2473 = vmatprep.mubr.f32.mxu1 %v4011_v61  ;;  %v4018_v61 = vld [vmem:[#allocation21_spill] sm:$0xff]  ;;  %v3020_v48 = vpack.c.bf16 %v3710_v39, %v3705_v26  ;;  %v3044_v51 = vpack.c.bf16 %v4035_v29, %v4034_v1  ;;  %v3048_v22 = vpack.c.bf16 %v1615_v42, %v4039_v14 }
  0x74   :  { %2853 = vmatprep.subr.bf16.mxu1 %v2852_v58  ;;  %2672 = vmatmul.mubr.f32.gmra.mrb[2].mxu0 %v1571_v18  ;;  %v4032_v18 = vand.u32 4294901760, %v4031_v23 }
  0x75   :  { %2999 = vmatpush3.bf16.msra.mxu0 %v2996_v57  ;;  %2690 = vmatprep.mubr.f32.mxu0 %v3546_v32  ;;  %v4019_v57 = vld [vmem:[#allocation24_spill] sm:$0xff] }
  0x76   :  { %3001 = vmatprep.subr.bf16.mxu0 %v3000_v15  ;;  %2474 = vmatmul.mubr.f32.gmra.mrb[2].mxu1 %v4014_v56  ;;  %v869_v20 = vsub.f32 %v4031_v23, %v4032_v18 }
  0x77   :  { %2855 = vmatpush3.bf16.msra.mxu1 %v2852_v58  ;;  %2492 = vmatprep.mubr.f32.mxu1 %v3393_v12  ;;  %v4029_v58 = vld [vmem:[#allocation20_spill] sm:$0xff] }
  0x78   :  { %2857 = vmatprep.subr.bf16.mxu1 %v2856_v63 }
  0x79   :  { %3003 = vmatpush3.bf16.msra.mxu0 %v3000_v15  ;;  %v4030_v15 = vand.u32 4294901760, %v4029_v58 }
  0x7a   :  { %3005 = vmatprep.subr.bf16.mxu0 %v3004_v9 }
  0x7b   :  { %2859 = vmatpush3.bf16.msra.mxu1 %v2856_v63  ;;  %v859_v25 = vsub.f32 %v4029_v58, %v4030_v15 }
  0x7c   :  { %2861 = vmatprep.subr.bf16.mxu1 %v2860_v4 }
  0x7d   :  { %3007 = vmatpush3.bf16.msra.mxu0 %v3004_v9  ;;  %v860_v63 = vand.u32 4294901760, %v859_v25  ;;  %v4036_v9 = vld [vmem:[#allocation25_spill] sm:$0xff] }
  0x7e   :  { %3009 = vmatprep.subr.bf16.mxu0 %v3008_v11  ;;  %v4037_v56 = vand.u32 4294901760, %v4036_v9 }
  0x7f   :  { %2863 = vmatpush3.bf16.msra.mxu1 %v2860_v4  ;;  %v870_v4 = vand.u32 4294901760, %v869_v20 }
  0x80   :  { %2691 = vmatmul.mubr.f32.vlgmr.msra.gmra.mrb[0].mxu0 %v3574_v33  ;;  %2865 = vmatprep.subr.bf16.mxu1 %v3276_v16  ;;  %v879_v36 = vsub.f32 %v4036_v9, %v4037_v56 }
  0x81   :  { %3011 = vmatpush3.bf16.msra.mxu0 %v3008_v11  ;;  %2693 = vmatprep.mubr.f32.mxu0 %v3632_v10  ;;  %v4040_v11 = vand.u32 4294901760, %v3663_v21 }
  0x82   :  { %3013 = vmatprep.subr.bf16.mxu0 %v3012_v17  ;;  %2493 = vmatmul.mubr.f32.vlgmr.msra.gmra.mrb[0].mxu1 %v4017_v6 }
  0x83   :  { %2867 = vmatpush3.bf16.msra.mxu1 %v3276_v16  ;;  %2495 = vmatprep.mubr.f32.mxu1 %v4018_v61  ;;  %v4021_v16 = vld [vmem:[#allocation18_spill] sm:$0xff] }
  0x84   :  { %2869 = vmatprep.subr.bf16.mxu1 %v3287_v24  ;;  %2694 = vmatmul.mubr.f32.gmra.mrb[2].mxu0 %v3665_v35  ;;  %v4022_v8 = vand.u32 4294901760, %v4021_v16 }
  0x85   :  { %3015 = vmatpush3.bf16.msra.mxu0 %v3012_v17  ;;  %2712 = vmatprep.mubr.f32.mxu0 %v4020_v7  ;;  %v880_v17 = vand.u32 4294901760, %v879_v36 }
  0x86   :  { %3017 = vmatprep.subr.bf16.mxu0 %v3016_v31  ;;  %2496 = vmatmul.mubr.f32.gmra.mrb[2].mxu1 %v4019_v57  ;;  %v849_v40 = vsub.f32 %v4021_v16, %v4022_v8 }
  0x87   :  { %2871 = vmatpush3.bf16.msra.mxu1 %v3287_v24  ;;  %2514 = vmatprep.mubr.f32.mxu1 %v3393_v12  ;;  %v4023_v24 = vld [vmem:[#allocation12_spill] sm:$0xff]  ;;  %v4024_v12 = vld [vmem:[#allocation13_spill] sm:$0xff] }
  0x88   :  { %2873 = vmatprep.subr.bf16.mxu1 %v3309_v37 }
  0x89   :  { %3019 = vmatpush3.bf16.msra.mxu0 %v3016_v31 }
  0x8a   :  { %3021 = vmatprep.subr.bf16.mxu0 %v3020_v48 }
  0x8b   :  { %2875 = vmatpush3.bf16.msra.mxu1 %v3309_v37  ;;  %v850_v37 = vand.u32 4294901760, %v849_v40 }
  0x8c   :  { %2877 = vmatprep.subr.bf16.mxu1 %v3334_v45 }
  0x8d   :  { %3023 = vmatpush3.bf16.msra.mxu0 %v3020_v48 }
  0x8e   :  { %3025 = vmatprep.subr.bf16.mxu0 %v3583_v55 }
  0x8f   :  { %2879 = vmatpush3.bf16.msra.mxu1 %v3334_v45  ;;  %v4025_v45 = vand.u32 4294901760, %v4020_v7 }
  0x90   :  { %2713 = vmatmul.mubr.f32.vlgmr.msra.gmra.mrb[0].mxu0 %v3617_v41  ;;  %2881 = vmatprep.subr.bf16.mxu1 %v4023_v24  ;;  %v3052_v41 = vpack.c.bf16 %v1629_v47, %v1622_v34 }
  0x91   :  { %3027 = vmatpush3.bf16.msra.mxu0 %v3583_v55  ;;  %2715 = vmatprep.mubr.f32.mxu0 %v3663_v21 }
  0x92   :  { %3029 = vmatprep.subr.bf16.mxu0 %v3588_v49  ;;  %2515 = vmatmul.mubr.f32.vlgmr.msra.gmra.mrb[0].mxu1 %v4017_v6 }
  0x93   :  { %2883 = vmatpush3.bf16.msra.mxu1 %v4023_v24  ;;  %2517 = vmatprep.mubr.f32.mxu1 %v4018_v61 }
  0x94   :  { %2885 = vmatprep.subr.bf16.mxu1 %v4024_v12  ;;  %2716 = vmatmul.mubr.f32.gmra.mrb[2].mxu0 %v3713_v43 }
  0x95   :  { %3031 = vmatpush3.bf16.msra.mxu0 %v3588_v49  ;;  %2734 = vmatprep.mubr.f32.mxu0 %v4025_v45 }
  0x96   :  { %3033 = vmatprep.subr.bf16.mxu0 %v3590_v54  ;;  %2518 = vmatmul.mubr.f32.gmra.mrb[2].mxu1 %v4019_v57 }
  0x97   :  { %2887 = vmatpush3.bf16.msra.mxu1 %v4024_v12  ;;  %2536 = vmatprep.mubr.f32.mxu1 %v850_v37 }
  0x98   :  { %2889 = vmatprep.subr.bf16.mxu1 %v4026_v53 }
  0x99   :  { %3035 = vmatpush3.bf16.msra.mxu0 %v3590_v54 }
  0x9a   :  { %3037 = vmatprep.subr.bf16.mxu0 %v3596_v5 }
  0x9b   :  { %2891 = vmatpush3.bf16.msra.mxu1 %v4026_v53 }
  0x9c   :  { %2893 = vmatprep.subr.bf16.mxu1 %v4033_v50 }
  0x9d   :  { %3039 = vmatpush3.bf16.msra.mxu0 %v3596_v5 }
  0x9e   :  { %3041 = vmatprep.subr.bf16.mxu0 %v3040_v46 }
  0x9f   :  { %2895 = vmatpush3.bf16.msra.mxu1 %v4033_v50 }
  0xa0   :  { %2735 = vmatmul.mubr.f32.vlgmr.msra.gmra.mrb[0].mxu0 %v4038_v0  ;;  %2897 = vmatprep.subr.bf16.mxu1 %v3638_v59 }
  0xa1   :  { %3043 = vmatpush3.bf16.msra.mxu0 %v3040_v46  ;;  %2737 = vmatprep.mubr.f32.mxu0 %v4040_v11 }
  0xa2   :  { %3045 = vmatprep.subr.bf16.mxu0 %v3044_v51  ;;  %2537 = vmatmul.mubr.f32.vlgmr.msra.gmra.mrb[0].mxu1 %v860_v63 }
  0xa3   :  { %2899 = vmatpush3.bf16.msra.mxu1 %v3638_v59  ;;  %2539 = vmatprep.mubr.f32.mxu1 %v870_v4  ;;  %v4043_v59 = vld [vmem:[#allocation19_spill] sm:$0xff] }
  0xa4   :  { %2901 = vmatprep.subr.bf16.mxu1 %v3667_v60  ;;  %2738 = vmatmul.mubr.f32.gmra.mrb[2].mxu0 %v4041_v13 }
  0xa5   :  { %3047 = vmatpush3.bf16.msra.mxu0 %v3044_v51  ;;  %2756 = vmatprep.mubr.f32.mxu0 %v3546_v32 }
  0xa6   :  { %3049 = vmatprep.subr.bf16.mxu0 %v3048_v22  ;;  %2540 = vmatmul.mubr.f32.gmra.mrb[2].mxu1 %v880_v17 }
  0xa7   :  { %2903 = vmatpush3.bf16.msra.mxu1 %v3667_v60  ;;  %2558 = vmatprep.mubr.f32.mxu1 %v4042_v19 }
  0xa8   :  { %2905 = vmatprep.subr.bf16.mxu1 %v3677_v2 }
  0xa9   :  { %3051 = vmatpush3.bf16.msra.mxu0 %v3048_v22 }
  0xaa   :  { %3053 = vmatprep.subr.bf16.mxu0 %v3052_v41 }
  0xab   :  { %2907 = vmatpush3.bf16.msra.mxu1 %v3677_v2  ;;  %v4044_v2 = vld [vmem:[#allocation22_spill] sm:$0xff] }
  0xac   :  { %2909 = vmatprep.subr.bf16.mxu1 %v3693_v62 }
  0xad   :  { %3055 = vmatpush3.bf16.msra.mxu0 %v3052_v41 }
  0xae   :  { %3057 = vmatprep.subr.bf16.mxu0 %v3583_v55 }
  0xaf   :  { %2911 = vmatpush3.bf16.msra.mxu1 %v3693_v62 }
  0xb0   :  { %2757 = vmatmul.mubr.f32.vlgmr.msra.gmra.mrb[0].mxu0 %v3574_v33  ;;  %2913 = vmatprep.subr.bf16.mxu1 %v3672_v28 }
  0xb1   :  { %3059 = vmatpush3.bf16.msra.mxu0 %v3583_v55  ;;  %2759 = vmatprep.mubr.f32.mxu0 %v3632_v10 }
  0xb2   :  { %3061 = vmatprep.subr.bf16.mxu0 %v3588_v49  ;;  %2559 = vmatmul.mubr.f32.vlgmr.msra.gmra.mrb[0].mxu1 %v4043_v59 }
  0xb3   :  { %2915 = vmatpush3.bf16.msra.mxu1 %v3672_v28  ;;  %2561 = vmatprep.mubr.f32.mxu1 %v4044_v2 }
  0xb4   :  { %2917 = vmatprep.subr.bf16.mxu1 %v3681_v3  ;;  %2760 = vmatmul.mubr.f32.gmra.mrb[2].mxu0 %v3665_v35 }
  0xb5   :  { %3063 = vmatpush3.bf16.msra.mxu0 %v3588_v49  ;;  %2778 = vmatprep.mubr.f32.mxu0 %v3546_v32 }
  0xb6   :  { %3065 = vmatprep.subr.bf16.mxu0 %v3590_v54  ;;  %2562 = vmatmul.mubr.f32.gmra.mrb[2].mxu1 %v3512_v27 }
  0xb7   :  { %2919 = vmatpush3.bf16.msra.mxu1 %v3681_v3  ;;  %2580 = vmatprep.mubr.f32.mxu1 %v4021_v16 }
  0xb8   :  { %2921 = vmatprep.subr.bf16.mxu1 %v3685_v30 }
  0xb9   :  { %3067 = vmatpush3.bf16.msra.mxu0 %v3590_v54 }
  0xba   :  { %3069 = vmatprep.subr.bf16.mxu0 %v3596_v5 }
  0xbb   :  { %2923 = vmatpush3.bf16.msra.mxu1 %v3685_v30 }
  0xbc   :  { %2925 = vmatprep.subr.bf16.mxu1 %v3697_v52 }
  0xbd   :  { %3071 = vmatpush3.bf16.msra.mxu0 %v3596_v5  ;;  %v2171_v5 = vld [vmem:[%s3916_s2] ss:$0 sm:$0xff]  ;;  %s3190_s2 = scalar_lea.vmem %s2159_s12, 512 }
  0xbe   :  { %p3191_p2 = scmp.ne.s32.totalorder %s2159_s12, %s3190_s2  ;;  %p3196_p4 = scmp.lt.s32.totalorder %s3190_s2, %s3190_s2 }
  0xbf   :  { %2927 = vmatpush3.bf16.msra.mxu1 %v3697_v52 }
  0xc0   :  { %2779 = vmatmul.mubr.f32.vlgmr.msra.gmra.mrb[0].mxu0 %v3574_v33  ;;  %p3197_p5 = por %p3196_p4, %p3195_p3 }
  0xc1   :  { %2781 = vmatprep.mubr.f32.mxu0 %v3632_v10 }
  0xc2   :  { %2581 = vmatmul.mubr.f32.vlgmr.msra.gmra.mrb[0].mxu1 %v4029_v58  ;;  %p3198_p6 = pnand %p3197_p5, %p3191_p2 }
  0xc3   :  { %2583 = vmatprep.mubr.f32.mxu1 %v4031_v23 }
  0xc4   :  { %2782 = vmatmul.mubr.f32.gmra.mrb[2].mxu0 %v3665_v35 }
  0xc6   :  { %2584 = vmatmul.mubr.f32.gmra.mrb[2].mxu1 %v4036_v9 }
 0x193   :  { %v2780_v54 = vpop.f32.mrb[0].mxu0 }
 0x194   :  { %v2108_v55 = vpop.f32.mrb[1].mxu0 }
 0x195   :  { %v2582_v27 = vpop.f32.mrb[0].mxu1 }
 0x196   :  { %v3072_v32 = vadd.f32 %v2780_v54, %v2582_v27  ;;  %v1099_v49 = vpop.f32.mrb[1].mxu1 }
 0x197   :  { %v2783_v33 = vpop.f32.mrb[2].mxu0  ;;  %v3073_v60 = vadd.f32 %v2108_v55, %v1099_v49 }
 0x198   :  { %v2120_v10 = vpop.f32.mrb[3].mxu0  ;;  %v2142_v21 = vadd.f32 %v3072_v32, %v2171_v5 }
 0x199   :  { %v2141_v28 = vadd.f32 %v3073_v60, %v2171_v5  ;;  %v2585_v3 = vpop.f32.mrb[2].mxu1 }
 0x19a   :  { %v2146_v30 = vmax.f32 %v2142_v21, 0.0  ;;  %v3074_v42 = vadd.f32 %v2783_v33, %v2585_v3  ;;  %v1113_v35 = vpop.f32.mrb[3].mxu1 }
 0x19b   :  { %v2145_v62 = vmax.f32 %v2141_v28, 0.0  ;;  %v3075_v52 = vadd.f32 %v2120_v10, %v1113_v35 }
 0x19c   :  { %2150 = vst [vmem:[#allocation8 + $0x8] sm:$0xff] %v2146_v30  ;;  %v2144_v26 = vadd.f32 %v3074_v42, %v2171_v5 }
 0x19d   :  { %2149 = vst [vmem:[#allocation8] sm:$0xff] %v2145_v62  ;;  %v2143_v39 = vadd.f32 %v3075_v52, %v2171_v5 }
 0x19e   :  { %v2148_v43 = vmax.f32 %v2144_v26, 0.0 }
 0x19f   :  { %v2147_v34 = vmax.f32 %v2143_v39, 0.0 }
 0x1a0   :  { %2152 = vst [vmem:[#allocation8 + $0x18] sm:$0xff] %v2148_v43 }
 0x1a1   :  { %2151 = vst [vmem:[#allocation8 + $0x10] sm:$0xff] %v2147_v34 }
 0x1a2   :  { %3201 = shalt.err (!%p3198_p6)
}
 0x1a3   :  { %s3202_s15 = scalar_lea.hbm %s3917_s3, 512 }
 0x1a4   :  { %p3203_p7 = scmp.ne.s32.totalorder %s3917_s3, %s3202_s15  ;;  %p3206_p8 = scmp.lt.u32.totalorder %s3202_s15, %s3917_s3 }
 0x1a6   :  { %p3208_p9 = pnand %p3206_p8, %p3203_p7 }
 0x1a8   :  { %3211 = shalt.err (!%p3208_p9)
}
 0x1a9   :  { %2164 = dma.vmem_to_hbm [thread:$0]  %s2159_s12, 512, %s3917_s3, [#allocation5], %s3219_s22, %s3219_s22, %s3220_s23  }
 0x1aa   :  { %3216 = dma.done.wait [#allocation5], 512  }
 0x1ab   :  { %3217 = vsyncadd [#allocation5], 4294966784 }
 0x1ac   :  { %2168 = vsyncpa [#allocation4], 1 }
 0x1ad   :  { %2169 = vsyncpa [#allocation7], 1 }
 0x1ae   :  { %2170 = vsyncpa [#allocation5], 1 }

</bundles_post_ra>
